<compile_context>
chip_gen: v7x
topology: tpu7x:2x2x1
jax: 0.10.0
libtpu: 0.0.40
codegen_flags: <defaults>
</compile_context>

<pallas_src>
import jax
import jax.numpy as jnp
from jax.experimental import pallas as pl
from jax.experimental.pallas import tpu as pltpu


def _dummy_multi_kernel(prior_ref, classes_ref, out_ref):
    """Argmax over class_prior per single, gather class, broadcast over batch tile.

    prior_ref   : (T, C) class priors per single classifier (VMEM-resident)
    classes_ref : (T, C) class label values per single classifier (VMEM-resident)
    out_ref     : (T, TILE_N) lane-dense output tile (batch along the lane axis)
    """
    prior = prior_ref[...]                                            # (T, C)
    cls = classes_ref[...]                                            # (T, C)
    T, C = prior.shape

    # First-max index along C per row (matches torch.argmax tie-breaking).
    col = jax.lax.broadcasted_iota(jnp.int32, (T, C), 1)              # (T, C)
    max_p = jnp.max(prior, axis=-1, keepdims=True)                    # (T, 1)
    is_max = prior == max_p                                           # (T, C)
    first_idx = jnp.min(jnp.where(is_max, col, C), axis=-1,
                        keepdims=True)                                # (T, 1)

    # Gather classes[t, argmax_t] via one-hot masked sum.
    sel = jnp.sum(jnp.where(col == first_idx, cls, jnp.zeros_like(cls)),
                  axis=-1, keepdims=True)                             # (T, 1)

    # Lane-broadcast each single's predicted class across the batch tile.
    out_ref[...] = jnp.broadcast_to(sel, out_ref.shape).astype(out_ref.dtype)


def dummy_classifier_multi_predict(x, class_priors, classes,
                                   strategy="most_frequent", tile_n=2048):
    """Pallas implementation of TorchDummyClassifierMulti.predict / forward.

    x            : [N, D]  (only N is used; features are never read)
    class_priors : [T, C]  stacked class_prior of each single classifier
    classes      : [T, C]  stacked class label values of each single classifier
    returns      : [N, T]  stacked per-single constant predictions
    """
    assert strategy in ("most_frequent", "prior"), \
        "only deterministic strategies are implemented"
    N = x.shape[0]
    T, C = class_priors.shape

    # Lane tile: multiple of 128, no larger than needed to cover N.
    tile_n = int(min(tile_n, ((N + 127) // 128) * 128))
    tile_n = max(tile_n, 128)
    grid = (pl.cdiv(N, tile_n),)

    out_tn = pl.pallas_call(
        _dummy_multi_kernel,
        out_shape=jax.ShapeDtypeStruct((T, N), classes.dtype),
        grid=grid,
        in_specs=[
            pl.BlockSpec((T, C), lambda i: (0, 0)),   # class_priors (resident)
            pl.BlockSpec((T, C), lambda i: (0, 0)),   # classes      (resident)
        ],
        out_specs=pl.BlockSpec((T, tile_n), lambda i: (0, i)),
        compiler_params=pltpu.CompilerParams(
            dimension_semantics=("parallel",)),
        cost_estimate=pl.CostEstimate(
            flops=0,
            transcendentals=0,
            bytes_accessed=(N * T * classes.dtype.itemsize
                            + 2 * T * C * class_priors.dtype.itemsize)),
    )(class_priors, classes)

    # [T, N] -> [N, T] to match torch.stack(..., dim=1); layout plumbing only.
    return out_tn.T


if __name__ == "__main__":
    key = jax.random.PRNGKey(0)
    k_x, k_p = jax.random.split(key)

    # Small synthetic shapes consistent with the module:
    #   N=300 batch rows (ragged vs the 128-lane tile, exercises multi-tile +
    #   masked edge), D=16 features (ignored), T=3 singles, C=4 classes each.
    N, D, T, C = 300, 16, 3, 4

    x = jax.random.normal(k_x, (N, D), dtype=jnp.float32)

    # Deterministic parameter init: class priors (positive, normalized rows)
    # and class label values (0..C-1 per single, offset per single).
    raw = jax.random.uniform(k_p, (T, C), dtype=jnp.float32) + 0.1
    class_priors = raw / jnp.sum(raw, axis=-1, keepdims=True)
    classes = (jnp.arange(C, dtype=jnp.float32)[None, :]
               + 10.0 * jnp.arange(T, dtype=jnp.float32)[:, None])   # (T, C)

    out = dummy_classifier_multi_predict(x, class_priors, classes,
                                         strategy="most_frequent", tile_n=128)
    out = jax.block_until_ready(out)

    # Pure-JAX reference of the PyTorch semantics:
    #   torch.stack([classes[t][class_prior[t].argmax()].repeat(N) for t], dim=1)
    idx_ref = jnp.argmax(class_priors, axis=-1)                       # (T,)
    sel_ref = jnp.take_along_axis(classes, idx_ref[:, None], axis=1)[:, 0]  # (T,)
    ref = jnp.broadcast_to(sel_ref[None, :], (N, T))

    assert out.shape == (N, T), out.shape
    assert jnp.allclose(out, ref), (out, ref)
    print("KERNEL_OK")
</pallas_src>

<mosaic_0001>
module attributes {stable_mosaic.version = 11 : i64} {
  func.func @_dummy_multi_kernel(%arg0: i32, %arg1: memref<3x4xf32, #tpu.memory_space<vmem>>, %arg2: memref<3x4xf32, #tpu.memory_space<vmem>>, %arg3: memref<3x128xf32, #tpu.memory_space<vmem>>) attributes {dimension_semantics = [#tpu.dimension_semantics<parallel>], iteration_bounds = array<i64: 3>, scalar_prefetch = 0 : i64, scratch_operands = 0 : i64, tpu.core_type = #tpu.core_type<tc>, window_params = [{pipeline_mode = #tpu.pipeline_mode<synchronous>, transform_indices = @transform_0, window_bounds = array<i64: 3, 4>}, {pipeline_mode = #tpu.pipeline_mode<synchronous>, transform_indices = @transform_1, window_bounds = array<i64: 3, 4>}, {transform_indices = @transform_2, window_bounds = array<i64: 3, 128>}]} {
    %c0 = arith.constant 0 : index
    %c0_0 = arith.constant 0 : index
    %0 = vector.load %arg1[%c0, %c0_0] : memref<3x4xf32, #tpu.memory_space<vmem>>, vector<3x4xf32>
    %c0_1 = arith.constant 0 : index
    %c0_2 = arith.constant 0 : index
    %1 = vector.load %arg2[%c0_1, %c0_2] : memref<3x4xf32, #tpu.memory_space<vmem>>, vector<3x4xf32>
    %2 = tpu.iota {dimensions = array<i32: 1>} : vector<3x4xi32>
    %cst = arith.constant dense<0xFF800000> : vector<3xf32>
    %3 = vector.multi_reduction <maximumf>, %0, %cst [1] : vector<3x4xf32> to vector<3xf32>
    %4 = vector.shape_cast %3 : vector<3xf32> to vector<3x1xf32>
    %5 = vector.broadcast %4 : vector<3x1xf32> to vector<3x4xf32>
    %6 = arith.cmpf oeq, %0, %5 : vector<3x4xf32>
    %c4_i32 = arith.constant 4 : i32
    %7 = vector.broadcast %c4_i32 : i32 to vector<3x4xi32>
    %8 = arith.select %6, %2, %7 : vector<3x4xi1>, vector<3x4xi32>
    %cst_3 = arith.constant dense<2147483647> : vector<3xi32>
    %9 = vector.multi_reduction <minsi>, %8, %cst_3 [1] : vector<3x4xi32> to vector<3xi32>
    %10 = vector.shape_cast %9 : vector<3xi32> to vector<3x1xi32>
    %11 = vector.broadcast %10 : vector<3x1xi32> to vector<3x4xi32>
    %12 = arith.cmpi eq, %2, %11 : vector<3x4xi32>
    %cst_4 = arith.constant 0.000000e+00 : f32
    %13 = vector.broadcast %cst_4 : f32 to vector<3x4xf32>
    %14 = arith.select %12, %1, %13 : vector<3x4xi1>, vector<3x4xf32>
    %cst_5 = arith.constant dense<0.000000e+00> : vector<3xf32>
    %15 = vector.multi_reduction <add>, %14, %cst_5 [1] : vector<3x4xf32> to vector<3xf32>
    %16 = vector.shape_cast %15 : vector<3xf32> to vector<3x1xf32>
    %17 = vector.shape_cast %16 : vector<3x1xf32> to vector<3x1xf32>
    %18 = vector.broadcast %17 : vector<3x1xf32> to vector<3x128xf32>
    %c0_6 = arith.constant 0 : index
    %c0_7 = arith.constant 0 : index
    %19 = vector.load %arg3[%c0_6, %c0_7] : memref<3x128xf32, #tpu.memory_space<vmem>>, vector<3x128xf32>
    tpu.vector_store %arg3[%c0_6, %c0_7], %18 {strides = array<i32>} : memref<3x128xf32, #tpu.memory_space<vmem>>, vector<3x128xf32>,
    return
  }
  func.func @transform_0(%arg0: i32) -> (i32, i32) {
    %c0_i32 = arith.constant 0 : i32
    %c0_i32_0 = arith.constant 0 : i32
    %c0_i32_1 = arith.constant 0 : i32
    return %c0_i32, %c0_i32_0 : i32, i32
  }
  func.func @transform_1(%arg0: i32) -> (i32, i32) {
    %c0_i32 = arith.constant 0 : i32
    %c0_i32_0 = arith.constant 0 : i32
    %c0_i32_1 = arith.constant 0 : i32
    return %c0_i32, %c0_i32_0 : i32, i32
  }
  func.func @transform_2(%arg0: i32) -> (i32, i32) {
    %c0_i32 = arith.constant 0 : i32
    %c0_i32_0 = arith.constant 0 : i32
    return %c0_i32, %arg0 : i32, i32
  }
}

</mosaic_0001>

<bundles_post_ra>
// kernel: tpu_custom_call.1
= control target key start
LH: loop header
LB: loop body
LE: loop exit
PB: predicated region body
PF: predicated region fallthrough
CT: control target
= control target key end

     0   :  { %7 = vsyncpa [#allocation3], 0  ;;  %s650_s0 = inlined_call_operand.hbm [shape: f32[3,4], index: 0, kind: input, shape index: {}]   ;;  %s651_s1 = inlined_call_operand.hbm [shape: f32[3,4], index: 1, kind: input, shape index: {}]   ;;  %s652_s2 = inlined_call_operand.hbm [shape: f32[3,300], index: 2, kind: output, shape index: {}]  }
   0x1   :  { %8 = vsyncpa [#allocation6], 0 }
   0x2   :  { %9 = vsyncpa [#allocation4], 0 }
   0x3   :  { %11 = vsyncpa [#allocation4 + $0x1], 0  ;;  %s480_s9 = smov 0   ;;  %s482_s10 = smov 0  }
   0x4   :  { %s484_s11 = smov 0   ;;  %s486_s12 = smov 0  }
   0x5 LB: > { %s501_s13 = sadd.s32 4294967295, %s460_s12   ;;  %s262_s14 = sadd.s32 4294967294, %s460_s12   ;;  %s460_s12 = sphi %s486_s12, %s670_s12   ;;  %s456_s11 = sphi %s484_s11, %s669_s11   ;;  %s452_s10 = sphi %s482_s10, %s668_s10   ;;  %s448_s9 = sphi %s480_s9, %s667_s9  }
   0x6   : > { %s505_s15 = sadd.s32 1, %s460_s12   ;;  %s66_s16 = sadd.s32 1, %s456_s11 }
   0x7   : > { %s63_s17 = ssub.s32 %s460_s12, %s505_s15  ;;  %p76_p0 = scmp.ne.s32.totalorder %s456_s11, %s452_s10 }
   0x8   : > { %p64_p1 = scmp.eq.s32.totalorder %s63_s17, 0  ;;  %p77_p2 = scmp.eq.s32.totalorder %s501_s13, 2 }
   0x9   : > { %p82_p3 = scmp.ne.s32.totalorder %s452_s10, %s448_s9  ;;  %p83_p4 = scmp.eq.s32.totalorder %s262_s14, 2 }
   0xa   : > { %s516_s18 = scalar_select %p64_p1, %s456_s11, %s66_s16  }
   0xb   : > { %p518_p5 = por %p77_p2, %p76_p0  ;;  %p522_p6 = por %p83_p4, %p82_p3 }
   0xc   : > { %p263_p7 = scmp.ge.s32.totalorder %s460_s12, 1  ;;  %p90_p8 = scmp.lt.s32.totalorder %s460_s12, 4 }
   0xd   : > { %s656_s19 = scalar_select %p518_p5, 1, 0 }
   0xe   : > { %s657_s20 = scalar_select %p522_p6, 1, 0 }
   0xf   : > { %p653_p9 = scmp.eq.s32.totalorder %s501_s13, 0  ;;  %p529_p10 = pnand %p263_p7, %p90_p8 }
  0x10   : > { %s462_s22 = smov [#allocation2]   ;;  %s463_s24 = smov [#allocation5]  }
  0x11   : > { %s658_s21 = scalar_select %p529_p10, 1, 0 }
  0x12   : > { %s103_s23 = sshll.u32 %s462_s22, 4  ;;  %p284_p11 = pneg %p529_p10  ;;  %s104_s23 = int_to_ptr.vmem [resolvable:$true] %s103_s23 }
  0x13   : > { %s114_s25 = sshll.u32 %s463_s24, 4  ;;  %s334_s29 = scalar_lea.hbm %s650_s0, 64  ;;  %s541_s25 = int_to_ptr.vmem [resolvable:$true] %s114_s25 }
  0x14   : > { %p537_p12 = pnand %p653_p9, %p284_p11  ;;  %p335_p13 = scmp.ne.s32.totalorder %s650_s0, %s334_s29 }
  0x15   : > { %p341_p3 = scmp.lt.u32.totalorder %s334_s29, %s650_s0 }
  0x16   : > { %p336_p0 = pneg %p537_p12 }
  0x18   : > { %p337_p1 = pnand %p336_p0, %p335_p13 }
  0x1a   : > { %p338_p2 = pneg %p337_p1 }
  0x1c   : > { %p343_p4 = pnand %p341_p3, %p338_p2 }
  0x1e   : > { %346 = shalt.err (!%p343_p4)
}
  0x1f   : > { %s347_s6 = scalar_lea.vmem %s104_s23, 64  ;;  %p355_p9 = scmp.lt.s32.totalorder %s104_s23, %s104_s23 }
  0x20   : > { %p348_p7 = scmp.ne.s32.totalorder %s104_s23, %s347_s6  ;;  %p356_p6 = scmp.lt.s32.totalorder %s347_s6, %s347_s6 }
  0x22   : > { %p350_p8 = pnand %p348_p7, %p336_p0  ;;  %p357_p5 = por %p356_p6, %p355_p9 }
  0x24   : > { %p351_p11 = pneg %p350_p8 }
  0x26   : > { %p358_p10 = pnand %p357_p5, %p351_p11 }
  0x28   : > { %361 = shalt.err (!%p358_p10)
}
  0x29   : > { %287 = dma.hbm_to_vmem [thread:$0]  (!%p537_p12), %s650_s0, 64, %s104_s23, [#allocation3]  }
  0x2a   : > { %s362_s17 = scalar_lea.hbm %s651_s1, 64 }
  0x2b   : > { %p363_p13 = scmp.ne.s32.totalorder %s651_s1, %s362_s17  ;;  %p369_p9 = scmp.lt.u32.totalorder %s362_s17, %s651_s1 }
  0x2d   : > { %p365_p6 = pnand %p363_p13, %p336_p0 }
  0x2f   : > { %p366_p5 = pneg %p365_p6 }
  0x31   : > { %p371_p10 = pnand %p369_p9, %p366_p5 }
  0x33   : > { %374 = shalt.err (!%p371_p10)
}
  0x34   : > { %s375_s23 = scalar_lea.vmem %s541_s25, 64  ;;  %p383_p4 = scmp.lt.s32.totalorder %s541_s25, %s541_s25 }
  0x35   : > { %p376_p1 = scmp.ne.s32.totalorder %s541_s25, %s375_s23  ;;  %p384_p7 = scmp.lt.s32.totalorder %s375_s23, %s375_s23 }
  0x37   : > { %p378_p2 = pnand %p376_p1, %p336_p0  ;;  %p385_p8 = por %p384_p7, %p383_p4 }
  0x39   : > { %p379_p3 = pneg %p378_p2 }
  0x3b   : > { %p386_p11 = pnand %p385_p8, %p379_p3 }
  0x3d   : > { %389 = shalt.err (!%p386_p11)
}
  0x3e   : > { %290 = dma.hbm_to_vmem [thread:$0]  (!%p537_p12), %s651_s1, 64, %s541_s25, [#allocation6]  }
  0x3f   : > { %p660_p13 = scmp.ne.s32.totalorder %s658_s21, 0 }
  0x40   : > { %p661_p6 = scmp.eq.s32.totalorder (!%p660_p13), %s501_s13, 0 }
  0x41   : > { %127 = sbr.rel (%p660_p13) target bundleno = 677 (0x2a5), region = 28 }
  0x48   : > { %435 = dma.done.wait (%p661_p6), [#allocation3], 64   ;;  %p662_p0 = pmov %p661_p6 }
  0x4a   : > { %437 = vsyncadd (%p662_p0), [#allocation3], 4294967232  ;;  %p663_p5 = pmov %p662_p0 }
  0x4b   : > { %p664_p9 = pmov %p662_p0 }
  0x4c   : > { %439 = dma.done.wait (%p663_p5), [#allocation6], 64  }
  0x4d   : > { %441 = vsyncadd (%p664_p9), [#allocation6], 4294967232  ;;  %vm152_vm0 = vcmask 26624   ;;  %v148_v0 = vld [vmem:[#allocation2] sm:$0x7]  ;;  %v150_v2 = vlaneseq  ;;  %s145_s21 = sand.u32 1, %s452_s10  }
  0x4e   : > { %v153_v1 = vsel %vm152_vm0, %v148_v0, -inf  ;;  %v149_v18 = vld [vmem:[#allocation5] sm:$0x7]  ;;  %s269_s25 = sshll.u32 %s145_s21, 2  ;;  %s271_s4 = sshll.u32 %s501_s13, 6 }
  0x4f   : > { %154 = vmax.xlane.f32.xlu0 %v153_v1  ;;  %v151_v3 = vand.u32 127, %v150_v2  ;;  %s147_s26 = scalar_lea.vmem [#allocation7], %s269_s25  ;;  %s610_s7 = scalar_lea.hbm %s652_s2, %s271_s4 }
  0x50   : > { %s193_s3 = sshll.u32 %s147_s26, 4  ;;  %s180_s8 = scalar_lea.sflag [#allocation4], %s145_s21  ;;  %s605_s3 = int_to_ptr.vmem [resolvable:$true] %s193_s3 }
  0x51   : > { %s390_s14 = scalar_lea.vmem %s605_s3, 64  ;;  %p665_p10 = scmp.ne.s32.totalorder %s656_s19, 0 }
  0x52   : > { %p391_p12 = scmp.ne.s32.totalorder %s605_s3, %s390_s14  ;;  %s464_s16 = smov [#allocation7]  }
  0x53   : > { %s394_s13 = sshll.u32 %s464_s16, 4  ;;  %s395_s13 = int_to_ptr.vmem [resolvable:$false] %s394_s13 }
  0x54   : > { %p392_p1 = pnand %p391_p12, %p665_p10  ;;  %s396_s17 = scalar_lea.vmem %s395_s13, 128 }
  0x55   : > { %p397_p3 = scmp.lt.s32.totalorder %s605_s3, %s395_s13  ;;  %p398_p4 = scmp.lt.s32.totalorder %s396_s17, %s390_s14 }
  0x56   : > { %p393_p2 = pneg %p392_p1 }
  0x57   : > { %p399_p7 = por %p398_p4, %p397_p3 }
  0x59   : > { %p400_p8 = pnand %p399_p7, %p393_p2 }
  0xdc   : > { %v155_v4 = vpop.xlane.xlu0 %154 }
  0xdd   : > { %vm156_vm1 = vcmp.eq.f32.partialorder %v148_v0, %v155_v4 }
  0xde   : > { %v157_v5 = vsel %vm156_vm1, %v151_v3, 4 }
  0xdf   : > { %v158_v6 = vsel %vm152_vm0, %v157_v5, 2147483647 }
  0xe0   : > { %v160_v7 = vshra.s32 %v158_v6, 16  ;;  %v159_v9 = vand.u32 65535, %v158_v6 }
  0xe2   : > { %v162_v8 = vcvt.s32.f32 %v160_v7  ;;  %v161_v11 = vcvt.s32.f32 %v159_v9 }
  0xe4   : > { %163 = vmin.xlane.f32.xlu0 %v162_v8 }
 0x171   : > { %v164_v10 = vpop.xlane.xlu0 %163 }
 0x172   : > { %vm165_vm2 = vcmp.eq.f32.partialorder %v162_v8, %v164_v10  ;;  %v170_v13 = vcvt.f32.s32 %v164_v10 }
 0x173   : > { %v166_v12 = vsel %vm165_vm2, %v161_v11, inf }
 0x174   : > { %167 = vmin.xlane.f32.xlu1 %v166_v12  ;;  %v171_v15 = vshll.u32 %v170_v13, 16 }
 0x201   : > { %v168_v14 = vpop.xlane.xlu1 %167 }
 0x202   : > { %v169_v16 = vcvt.f32.s32 %v168_v14 }
 0x204   : > { %v172_v17 = vadd.s32 %v171_v15, %v169_v16 }
 0x206   : > { %vm173_vm3 = vcmp.eq.s32.totalorder %v151_v3, %v172_v17 }
 0x207   : > { %v174_v19 = vsel %vm173_vm3, %v149_v18, 0.0 }
 0x208   : > { %v175_v20 = vsel %vm152_vm0, %v174_v19, 0.0 }
 0x209   : > { %176 = vadd.xlane.f32.xlu1 %v175_v20 }
 0x296   : > { %v177_v21 = vpop.xlane.xlu1 %176 }
 0x297   : > { %178 = vst [vmem:[%s147_s26] sm:$0x7] %v177_v21 }
 0x298   : > { %403 = shalt.err (!%p400_p8)
}
 0x299   : > { %s404_s22 = scalar_lea.hbm %s610_s7, 64  ;;  %s408_s28 = scalar_lea.hbm %s652_s2, 192 }
 0x29a   : > { %p405_p11 = scmp.ne.s32.totalorder %s610_s7, %s404_s22  ;;  %p409_p0 = scmp.lt.u32.totalorder %s610_s7, %s652_s2 }
 0x29b   : > { %p410_p5 = scmp.lt.u32.totalorder %s408_s28, %s404_s22  ;;  %p412_p12 = scmp.lt.u32.totalorder %s404_s22, %s610_s7 }
 0x29c   : > { %p406_p13 = pnand %p405_p11, %p665_p10 }
 0x29d   : > { %p411_p9 = por %p410_p5, %p409_p0 }
 0x29e   : > { %p407_p6 = pneg %p406_p13 }
 0x29f   : > { %p413_p1 = por %p412_p12, %p411_p9 }
 0x2a1   : > { %p414_p2 = pnand %p413_p1, %p407_p6 }
 0x2a3   : > { %417 = shalt.err (!%p414_p2)
}
 0x2a4   : > { %282 = dma.vmem_to_hbm [thread:$0]  (%p665_p10), %s605_s3, 64, %s610_s7, %s180_s8  }
 0x2a5 PF: > { %p299_p3 = scmp.ge.s32.totalorder %s460_s12, 2  ;;  %s205_s30 = sand.u32 1, %s448_s9  }
 0x2a6   : > { %p666_p4 = scmp.ne.s32.totalorder %s657_s20, 0  ;;  %s206_s21 = scalar_lea.sflag [#allocation4], %s205_s30 }
 0x2a8   : > { %p292_p7 = pnand %p299_p3, %p666_p4 }
 0x2aa   : > { %443 = dma.done.wait (!%p292_p7), %s206_s21, 64  }
 0x2ab   : > { %445 = vsyncadd (!%p292_p7), %s206_s21, 4294967232  ;;  %p14_p8 = scmp.ge.s32.totalorder %s505_s15, 5   ;;  %s667_s9 = smov %s452_s10 }
 0x2ac   : > { %s668_s10 = smov %s456_s11  ;;  %s669_s11 = smov %s516_s18 }
 0x2ad   : > { %s670_s12 = smov %s505_s15  ;;  %16 = sbr.rel (!%p14_p8) target bundleno = 5 (0x5), region = 69 }
 0x2b4   :  { %211 = vsyncpa [#allocation3], 1 }
 0x2b5   :  { %213 = vsyncpa [#allocation3 + $0x1], 1 }
 0x2b6   :  { %214 = vsyncpa [#allocation6], 1 }
 0x2b7   :  { %215 = vsyncpa [#allocation4], 1 }
 0x2b8   :  { %217 = vsyncpa [#allocation4 + $0x1], 1 }

</bundles_post_ra>
